<compile_context>
chip_gen: v7x
topology: tpu7x:2x2x1
jax: 0.10.0
libtpu: 0.0.40
codegen_flags: <defaults>
</compile_context>

<pallas_src>
import functools

import jax
import jax.numpy as jnp
from jax.experimental import pallas as pl
from jax.experimental.pallas import tpu as pltpu

EPS = 1e-5  # nn.GroupNorm default eps


def _round_up(x, m):
    return (x + m - 1) // m * m


def _round_down(x, m):
    return x // m * m


def _vmem_capacity_bytes():
    try:
        info = pltpu.get_tpu_info()
        cap = getattr(info, "vmem_capacity_bytes", None)
        if cap:
            return int(cap)
    except Exception:
        pass
    return 128 << 20  # v5e/v6e-class default


def _sigmoid(xs):
    # Single-EUP sigmoid (tanh form); avoids exp(-xs) overflow and the recip chain.
    return 0.5 * jnp.tanh(0.5 * xs) + 0.5


# ----------------------------------------------------------------------------------
# Kernels
# ----------------------------------------------------------------------------------
def _sa_rows_kernel(x_ref, p_ref, o_ref, *, hw):
    """Single-slab path: a (tm, hw) row-block fully resident in VMEM."""
    x = x_ref[...].astype(jnp.float32)                       # (tm, hw)
    inv_hw = 1.0 / float(hw)
    mean = jnp.sum(x, axis=-1, keepdims=True) * inv_hw       # (tm, 1)
    d = x - mean
    var = jnp.sum(d * d, axis=-1, keepdims=True) * inv_hw    # biased var (GroupNorm)
    inv = jax.lax.rsqrt(var + EPS)
    p = p_ref[...]                                           # (tm, 2) = (scale, bias)
    a = p[:, 0:1] * inv                                      # fold affine into the norm
    b2 = p[:, 1:2] - a * mean
    gate = _sigmoid(a * x + b2)                              # 2 VALU ops + 1 EUP op
    o_ref[...] = (x * gate).astype(o_ref.dtype)


def _sa_stats_kernel(x_ref, p_ref, a_ref, b_ref, s1_ref, s2_ref, *, hw, thw):
    """Chunked path, pass 1: accumulate per-row sums over HW chunks, emit (a, b2)."""
    k = pl.program_id(1)

    @pl.when(k == 0)
    def _():
        s1_ref[...] = jnp.zeros_like(s1_ref)
        s2_ref[...] = jnp.zeros_like(s2_ref)

    x = x_ref[...].astype(jnp.float32)                       # (tm, thw)
    # Never rely on physical / out-of-bounds lane padding: mask lanes beyond hw.
    lane = jax.lax.broadcasted_iota(jnp.int32, x.shape, 1) + k * thw
    x = jnp.where(lane < hw, x, 0.0)
    s1_ref[...] += jnp.sum(x, axis=-1, keepdims=True)
    s2_ref[...] += jnp.sum(x * x, axis=-1, keepdims=True)

    @pl.when(k == pl.num_programs(1) - 1)
    def _():
        inv_hw = 1.0 / float(hw)
        mean = s1_ref[...] * inv_hw
        # TODO(synk): single-pass E[x^2]-mean^2 on the chunked path; a chunked Welford
        # update would be more robust for activations with a very large DC offset.
        var = jnp.maximum(s2_ref[...] * inv_hw - mean * mean, 0.0)
        inv = jax.lax.rsqrt(var + EPS)
        p = p_ref[...]
        a = p[:, 0:1] * inv
        a_ref[...] = a
        b_ref[...] = p[:, 1:2] - a * mean


def _sa_apply_kernel(x_ref, a_ref, b_ref, o_ref):
    """Chunked path, pass 2: out = x * sigmoid(a*x + b2)."""
    x = x_ref[...].astype(jnp.float32)
    gate = _sigmoid(a_ref[...] * x + b_ref[...])
    o_ref[...] = (x * gate).astype(o_ref.dtype)


# ----------------------------------------------------------------------------------
# Wrappers
# ----------------------------------------------------------------------------------
def _sa_single_slab(x2, params, hw, r, sub, dtype_bytes, hw_pad,
                    block_target_bytes, tm_max_by_vmem, cap_limit):
    row_hbm = hw * dtype_bytes
    tm = _round_down(block_target_bytes // max(row_hbm, 1), sub)
    tm = max(sub, min(tm, tm_max_by_vmem))
    min_tm = max(sub, _round_up(pl.cdiv(1 << 20, max(row_hbm, 1)), sub))  # ~1 MiB floor

    # Prefer >= 4 grid steps (>= 2 per TensorCore on megacore parts) ...
    steps = pl.cdiv(r, tm)
    if steps < 4:
        tm4 = _round_down(r // 4, sub)
        if tm4 >= min_tm:
            tm = min(tm, tm4)
            steps = pl.cdiv(r, tm)
    # ... and an even step count so both cores get equal work.
    if steps >= 2 and steps % 2 == 1:
        tm_even = _round_up(pl.cdiv(r, steps + 1), sub)
        if min_tm <= tm_even <= tm and pl.cdiv(r, tm_even) % 2 == 0:
            tm = tm_even
    if tm >= r:
        tm = r  # single full-dim block (always a legal block shape)
    grid0 = pl.cdiv(r, tm)

    tm_pad = _round_up(tm, sub)
    vmem_needed = (4 * tm_pad * hw_pad * dtype_bytes     # x / out, double-buffered
                   + 3 * tm_pad * hw_pad * 4             # f32 temporaries
                   + 4 * tm_pad * 128 * 4                # (tm, 2) params, lane-padded
                   + (6 << 20))                          # compiler scratch slack
    vmem_limit = int(min(max(vmem_needed, 16 << 20), cap_limit))

    kernel = functools.partial(_sa_rows_kernel, hw=hw)
    return pl.pallas_call(
        kernel,
        out_shape=jax.ShapeDtypeStruct((r, hw), x2.dtype),
        grid_spec=pltpu.PrefetchScalarGridSpec(
            num_scalar_prefetch=0,
            grid=(grid0,),
            in_specs=[pl.BlockSpec((tm, hw), lambda i: (i, 0)),
                      pl.BlockSpec((tm, 2), lambda i: (i, 0))],
            out_specs=pl.BlockSpec((tm, hw), lambda i: (i, 0)),
        ),
        compiler_params=pltpu.CompilerParams(
            dimension_semantics=("parallel",),
            vmem_limit_bytes=vmem_limit,
        ),
    )(x2, params)


def _sa_chunked(x2, params, hw, r, sub, dtype_bytes, block_target_bytes, cap_limit):
    """Two-pass HW-chunked path for spatial slabs too large to hold in VMEM."""
    tm = max(sub, min(_round_up(r, sub), 512))
    if tm >= r:
        tm = r
    tm_pad = _round_up(tm, sub)

    # HW chunk: multiple of 128 lanes, sized to the block target and the VMEM cap.
    per_lane_col = tm_pad * (4 * dtype_bytes + 8)        # in+out dbl-buffered + f32 temps
    thw_cap = _round_down(max(cap_limit - (16 << 20), 1 << 20) // per_lane_col, 128)
    thw = _round_down(block_target_bytes // max(tm_pad * dtype_bytes, 1), 128)
    thw = max(128, min(thw, max(thw_cap, 128), _round_up(hw, 128)))
    n_chunks = pl.cdiv(hw, thw)
    grid_r = pl.cdiv(r, tm)

    vmem_limit = int(min(max(per_lane_col * thw + 8 * tm_pad * 128 * 4 + (6 << 20),
                             16 << 20), cap_limit))

    a_arr, b_arr = pl.pallas_call(
        functools.partial(_sa_stats_kernel, hw=hw, thw=thw),
        out_shape=(jax.ShapeDtypeStruct((r, 1), jnp.float32),
                   jax.ShapeDtypeStruct((r, 1), jnp.float32)),
        grid_spec=pltpu.PrefetchScalarGridSpec(
            num_scalar_prefetch=0,
            grid=(grid_r, n_chunks),
            in_specs=[pl.BlockSpec((tm, thw), lambda i, k: (i, k)),
                      pl.BlockSpec((tm, 2), lambda i, k: (i, 0))],
            out_specs=[pl.BlockSpec((tm, 1), lambda i, k: (i, 0)),
                       pl.BlockSpec((tm, 1), lambda i, k: (i, 0))],
            scratch_shapes=[pltpu.VMEM((tm, 1), jnp.float32),
                            pltpu.VMEM((tm, 1), jnp.float32)],
        ),
        compiler_params=pltpu.CompilerParams(
            dimension_semantics=("parallel", "arbitrary"),
            vmem_limit_bytes=vmem_limit,
        ),
    )(x2, params)

    out2 = pl.pallas_call(
        _sa_apply_kernel,
        out_shape=jax.ShapeDtypeStruct((r, hw), x2.dtype),
        grid_spec=pltpu.PrefetchScalarGridSpec(
            num_scalar_prefetch=0,
            grid=(grid_r, n_chunks),
            in_specs=[pl.BlockSpec((tm, thw), lambda i, k: (i, k)),
                      pl.BlockSpec((tm, 1), lambda i, k: (i, 0)),
                      pl.BlockSpec((tm, 1), lambda i, k: (i, 0))],
            out_specs=pl.BlockSpec((tm, thw), lambda i, k: (i, k)),
        ),
        compiler_params=pltpu.CompilerParams(
            dimension_semantics=("parallel", "parallel"),
            vmem_limit_bytes=vmem_limit,
        ),
    )(x2, a_arr, b_arr)
    return out2


def sa_layer_forward(x, gn_weight, gn_bias, sweight, sbias, groups,
                     *, block_target_bytes=None, force_chunked=False):
    """x: (b, c, h, w). Per-channel params of shape (c//groups,) (or broadcastable)."""
    b, c, h, w = x.shape
    assert c % groups == 0
    c_g = c // groups
    n = b * groups
    hw = h * w
    r = n * c_g  # == b*c : one row per (sample, group, channel)

    dtype_bytes = jnp.dtype(x.dtype).itemsize
    sub = 16 if dtype_bytes == 2 else 8        # sublane multiple (bf16 packs 16 rows/vreg)
    hw_pad = _round_up(hw, 128)                # physical lane footprint in VMEM

    # Generation-aware budgets (v7x-class: 64 MiB VMEM/TC; v5e/v6e: 128 MiB).
    vmem_cap = _vmem_capacity_bytes()
    small_vmem = vmem_cap <= (64 << 20)
    cap_limit = (44 << 20) if small_vmem else (96 << 20)
    if block_target_bytes is None:
        block_target_bytes = (4 << 20) if small_vmem else (8 << 20)

    # Fold GroupNorm affine and sweight/sbias into one per-channel (scale, bias):
    #   xs = sw*(gamma*y + beta) + sb = (gamma*sw)*y + (sw*beta + sb)
    gn_weight = gn_weight.reshape(-1).astype(jnp.float32)
    gn_bias = gn_bias.reshape(-1).astype(jnp.float32)
    sweight = sweight.reshape(-1).astype(jnp.float32)
    sbias = sbias.reshape(-1).astype(jnp.float32)
    scale_cg = gn_weight * sweight
    bias_cg = sweight * gn_bias + sbias

    # 2-D layout, no padding / extra copies: rows = (batch*group, channel), lanes = hw.
    x2 = x.reshape(r, hw)
    params = jnp.stack([jnp.tile(scale_cg, n), jnp.tile(bias_cg, n)], axis=-1)  # (r, 2)

    # Can a (sub, hw) row-slab (double-buffered, with f32 temps) fit the VMEM budget?
    row_vmem = 4 * hw_pad * dtype_bytes + 3 * hw_pad * 4
    tm_max_by_vmem = _round_down(max(cap_limit - (8 << 20), 0) // row_vmem, sub)
    use_chunked = force_chunked or tm_max_by_vmem < sub

    if not use_chunked:
        out2 = _sa_single_slab(x2, params, hw, r, sub, dtype_bytes, hw_pad,
                               block_target_bytes, tm_max_by_vmem, cap_limit)
    else:
        out2 = _sa_chunked(x2, params, hw, r, sub, dtype_bytes,
                           block_target_bytes, cap_limit)

    out = out2.reshape(b, c, h, w)
    # channel_shuffle(out, groups=1) is an identity (reshape/permute/reshape no-op).
    return out


def sa_layer_reference(x, gn_weight, gn_bias, sweight, sbias, groups):
    """Pure-JAX reference mirroring the PyTorch forward (returns float32)."""
    b, c, h, w = x.shape
    c_g = c // groups
    xr = x.reshape(b * groups, c_g, h * w).astype(jnp.float32)
    mean = jnp.mean(xr, axis=-1, keepdims=True)
    var = jnp.mean((xr - mean) ** 2, axis=-1, keepdims=True)
    y = (xr - mean) / jnp.sqrt(var + EPS)
    xs = gn_weight.reshape(1, c_g, 1) * y + gn_bias.reshape(1, c_g, 1)
    xs = sweight.reshape(1, c_g, 1) * xs + sbias.reshape(1, c_g, 1)
    out = xr * jax.nn.sigmoid(xs)
    return out.reshape(b, c, h, w)


if __name__ == "__main__":
    key = jax.random.PRNGKey(0)
    configs = [
        # (shape, groups, dtype, forward kwargs, tolerance)
        ((2, 16, 16, 16), 4, jnp.float32, {}, 3e-5),
        ((2, 16, 7, 9), 4, jnp.float32, {}, 3e-5),        # hw % 128 != 0: no pad / slice path
        ((2, 16, 12, 11), 4, jnp.bfloat16, {}, 3e-2),     # bf16 I/O path
        ((2, 16, 17, 19), 4, jnp.float32,                 # force the HW-chunked 2-pass path
         dict(force_chunked=True, block_target_bytes=16 << 10), 1e-4),
    ]
    for shape, groups, dtype, kwargs, tol in configs:
        b, c, h, w = shape
        c_g = c // groups
        key, kx, k1, k2, k3, k4 = jax.random.split(key, 6)
        x = jax.random.normal(kx, (b, c, h, w), dtype=jnp.float32).astype(dtype)

        # Module init is zeros/ones; use non-trivial values so norm + affine + gate are
        # all exercised.
        gn_weight = 1.0 + 0.1 * jax.random.normal(k1, (c_g,), dtype=jnp.float32)
        gn_bias = 0.1 * jax.random.normal(k2, (c_g,), dtype=jnp.float32)
        sweight = 0.5 * jax.random.normal(k3, (c_g,), dtype=jnp.float32)
        sbias = 1.0 + 0.1 * jax.random.normal(k4, (c_g,), dtype=jnp.float32)

        out = sa_layer_forward(x, gn_weight, gn_bias, sweight, sbias, groups, **kwargs)
        out = jax.block_until_ready(out)
        assert out.shape == (b, c, h, w) and out.dtype == dtype

        ref = sa_layer_reference(x, gn_weight, gn_bias, sweight, sbias, groups)
        err = float(jnp.max(jnp.abs(out.astype(jnp.float32) - ref)))
        assert err <= tol, (shape, str(dtype), err)

    print("KERNEL_OK")
</pallas_src>

<mosaic_0001>
module attributes {stable_mosaic.version = 11 : i64} {
  func.func @_sa_rows_kernel(%arg0: i32, %arg1: memref<32x256xf32, #tpu.memory_space<vmem>>, %arg2: memref<32x2xf32, #tpu.memory_space<vmem>>, %arg3: memref<32x256xf32, #tpu.memory_space<vmem>>) attributes {dimension_semantics = [#tpu.dimension_semantics<parallel>], iteration_bounds = array<i64: 1>, scalar_prefetch = 0 : i64, scratch_operands = 0 : i64, tpu.core_type = #tpu.core_type<tc>, window_params = [{transform_indices = @transform_0, window_bounds = array<i64: 32, 256>}, {transform_indices = @transform_1, window_bounds = array<i64: 32, 2>}, {transform_indices = @transform_2, window_bounds = array<i64: 32, 256>}]} {
    %c0 = arith.constant 0 : index
    %c0_0 = arith.constant 0 : index
    %0 = vector.load %arg1[%c0, %c0_0] : memref<32x256xf32, #tpu.memory_space<vmem>>, vector<32x256xf32>
    %cst = arith.constant dense<0.000000e+00> : vector<32xf32>
    %1 = vector.multi_reduction <add>, %0, %cst [1] : vector<32x256xf32> to vector<32xf32>
    %2 = vector.shape_cast %1 : vector<32xf32> to vector<32x1xf32>
    %cst_1 = arith.constant 3.906250e-03 : f32
    %3 = vector.broadcast %cst_1 : f32 to vector<32x1xf32>
    %4 = arith.mulf %2, %3 : vector<32x1xf32>
    %5 = vector.broadcast %4 : vector<32x1xf32> to vector<32x256xf32>
    %6 = arith.subf %0, %5 : vector<32x256xf32>
    %7 = arith.mulf %6, %6 : vector<32x256xf32>
    %cst_2 = arith.constant dense<0.000000e+00> : vector<32xf32>
    %8 = vector.multi_reduction <add>, %7, %cst_2 [1] : vector<32x256xf32> to vector<32xf32>
    %9 = vector.shape_cast %8 : vector<32xf32> to vector<32x1xf32>
    %cst_3 = arith.constant 3.906250e-03 : f32
    %10 = vector.broadcast %cst_3 : f32 to vector<32x1xf32>
    %11 = arith.mulf %9, %10 : vector<32x1xf32>
    %cst_4 = arith.constant 9.99999974E-6 : f32
    %12 = vector.broadcast %cst_4 : f32 to vector<32x1xf32>
    %13 = arith.addf %11, %12 : vector<32x1xf32>
    %14 = math.rsqrt %13 : vector<32x1xf32>
    %c0_5 = arith.constant 0 : index
    %c0_6 = arith.constant 0 : index
    %15 = vector.load %arg2[%c0_5, %c0_6] : memref<32x2xf32, #tpu.memory_space<vmem>>, vector<32x2xf32>
    %16 = vector.extract_strided_slice %15 {offsets = [0, 0], sizes = [32, 1], strides = [1, 1]} : vector<32x2xf32> to vector<32x1xf32>
    %17 = arith.mulf %16, %14 : vector<32x1xf32>
    %18 = vector.extract_strided_slice %15 {offsets = [0, 1], sizes = [32, 1], strides = [1, 1]} : vector<32x2xf32> to vector<32x1xf32>
    %19 = arith.mulf %17, %4 : vector<32x1xf32>
    %20 = arith.subf %18, %19 : vector<32x1xf32>
    %21 = vector.broadcast %17 : vector<32x1xf32> to vector<32x256xf32>
    %22 = arith.mulf %21, %0 : vector<32x256xf32>
    %23 = vector.broadcast %20 : vector<32x1xf32> to vector<32x256xf32>
    %24 = arith.addf %22, %23 : vector<32x256xf32>
    %cst_7 = arith.constant 5.000000e-01 : f32
    %25 = vector.broadcast %cst_7 : f32 to vector<32x256xf32>
    %26 = arith.mulf %25, %24 : vector<32x256xf32>
    %27 = math.tanh %26 : vector<32x256xf32>
    %cst_8 = arith.constant 5.000000e-01 : f32
    %28 = vector.broadcast %cst_8 : f32 to vector<32x256xf32>
    %29 = arith.mulf %28, %27 : vector<32x256xf32>
    %cst_9 = arith.constant 5.000000e-01 : f32
    %30 = vector.broadcast %cst_9 : f32 to vector<32x256xf32>
    %31 = arith.addf %29, %30 : vector<32x256xf32>
    %32 = arith.mulf %0, %31 : vector<32x256xf32>
    %c0_10 = arith.constant 0 : index
    %c0_11 = arith.constant 0 : index
    %33 = vector.load %arg3[%c0_10, %c0_11] : memref<32x256xf32, #tpu.memory_space<vmem>>, vector<32x256xf32>
    tpu.vector_store %arg3[%c0_10, %c0_11], %32 {strides = array<i32>} : memref<32x256xf32, #tpu.memory_space<vmem>>, vector<32x256xf32>,
    return
  }
  func.func @transform_0(%arg0: i32) -> (i32, i32) {
    %c0_i32 = arith.constant 0 : i32
    %c0_i32_0 = arith.constant 0 : i32
    return %arg0, %c0_i32 : i32, i32
  }
  func.func @transform_1(%arg0: i32) -> (i32, i32) {
    %c0_i32 = arith.constant 0 : i32
    %c0_i32_0 = arith.constant 0 : i32
    return %arg0, %c0_i32 : i32, i32
  }
  func.func @transform_2(%arg0: i32) -> (i32, i32) {
    %c0_i32 = arith.constant 0 : i32
    %c0_i32_0 = arith.constant 0 : i32
    return %arg0, %c0_i32 : i32, i32
  }
}

</mosaic_0001>

<bundles_post_ra>
// kernel: tpu_custom_call.1
= control target key start
LH: loop header
LB: loop body
LE: loop exit
PB: predicated region body
PF: predicated region fallthrough
CT: control target
= control target key end

     0   :  { %7 = vsyncpa [#allocation3], 0  ;;  %s443_s0 = inlined_call_operand.hbm [shape: f32[32,256], index: 0, kind: input, shape index: {}]   ;;  %s444_s1 = inlined_call_operand.vmem [shape: f32[32,2], index: 1, kind: input, shape index: {}]   ;;  %s445_s2 = inlined_call_operand.hbm [shape: f32[32,256], index: 2, kind: output, shape index: {}]  }
   0x1   :  { %8 = vsyncpa [#allocation4], 0  ;;  %s326_s9 = smov [#allocation2]   ;;  %s278_s13 = scalar_lea.hbm %s443_s0, 1024 }
   0x2   :  { %s14_s10 = sshll.u32 %s326_s9, 4  ;;  %p279_p0 = scmp.ne.s32.totalorder %s443_s0, %s278_s13  ;;  %s15_s10 = int_to_ptr.vmem [resolvable:$true] %s14_s10 }
   0x3   :  { %p282_p1 = scmp.lt.u32.totalorder %s278_s13, %s443_s0 }
   0x5   :  { %p284_p2 = pnand %p282_p1, %p279_p0 }
   0x7   :  { %287 = shalt.err (!%p284_p2)
}
   0x8   :  { %s288_s18 = scalar_lea.vmem %s15_s10, 1024  ;;  %p293_p4 = scmp.lt.s32.totalorder %s15_s10, %s15_s10 }
   0x9   :  { %p289_p3 = scmp.ne.s32.totalorder %s15_s10, %s288_s18  ;;  %p294_p5 = scmp.lt.s32.totalorder %s288_s18, %s288_s18 }
   0xb   :  { %p295_p6 = por %p294_p5, %p293_p4 }
   0xd   :  { %p296_p7 = pnand %p295_p6, %p289_p3 }
   0xf   :  { %299 = shalt.err (!%p296_p7)
}
  0x10   :  { %s327_s19 = smov 256   ;;  %s328_s20 = smov 16  }
  0x11   :  { %20 = dma.hbm_to_vmem [thread:$0]  %s443_s0, 1024, %s15_s10, [#allocation3], %s327_s19, %s327_s19, %s328_s20  }
  0x12   :  { %322 = dma.done.wait [#allocation3], 1024  }
  0x13   :  { %323 = vsyncadd [#allocation3], 4294966272  ;;  %v363_v0 = vld [vmem:[#allocation2] sm:$0xff]  ;;  %v365_v1 = vld [vmem:[#allocation2 + $0x8] sm:$0xff]  ;;  %v329_v40 = vmov 0   ;;  %s330_s28 = smov 1  }
  0x14   :  { %v367_v2 = vld [vmem:[#allocation2 + $0x20] sm:$0xff]  ;;  %v34_v3 = vadd.f32 %v365_v1, %v363_v0  ;;  %v371_v4 = vld [vmem:[#allocation2 + $0x28] sm:$0xff]  ;;  %v373_v5 = vld [vmem:[#allocation2 + $0x10] sm:$0xff]  ;;  %250 = vset.pattern.permute.xlu0 %v329_v40  ;;  %251 = vset.pattern.permute.xlu1 %v329_v40 }
  0x15   :  { %v375_v6 = vld [vmem:[#allocation2 + $0x18] sm:$0xff]  ;;  %v40_v7 = vadd.f32 %v371_v4, %v367_v2  ;;  %v379_v8 = vld [vmem:[#allocation2 + $0x30] sm:$0xff]  ;;  %v90_v53 = vld [vmem:[%s444_s1] sm:$0xff] }
  0x16   :  { %v381_v9 = vld [vmem:[#allocation2 + $0x38] sm:$0xff]  ;;  %35 = vadd.xlane.f32.xlu0 %v34_v3  ;;  %v37_v10 = vadd.f32 %v375_v6, %v373_v5  ;;  %v91_v56 = vld [vmem:[%s444_s1 + $0x8] sm:$0xff]  ;;  %v92_v59 = vld [vmem:[%s444_s1 + $0x10] sm:$0xff] }
  0x17   :  { %41 = vadd.xlane.f32.xlu1 %v40_v7  ;;  %v43_v11 = vadd.f32 %v381_v9, %v379_v8  ;;  %v93_v7 = vld [vmem:[%s444_s1 + $0x18] sm:$0xff]  ;;  %s332_s1 = smov [#allocation5]  }
  0x18   :  { %s231_s3 = sshll.u32 %s332_s1, 4  ;;  %s232_s3 = int_to_ptr.vmem [resolvable:$true] %s231_s3 }
  0x19   :  { %s300_s4 = scalar_lea.vmem %s232_s3, 1024  ;;  %p305_p9 = scmp.lt.s32.totalorder %s232_s3, %s232_s3 }
  0x1a   :  { %38 = vadd.xlane.f32.xlu0 %v37_v10  ;;  %p301_p8 = scmp.ne.s32.totalorder %s232_s3, %s300_s4  ;;  %p306_p10 = scmp.lt.s32.totalorder %s300_s4, %s300_s4 }
  0x1b   :  { %44 = vadd.xlane.f32.xlu1 %v43_v11 }
  0x1c   :  { %p307_p11 = por %p306_p10, %p305_p9 }
  0x1e   :  { %p308_p12 = pnand %p307_p11, %p301_p8 }
  0xa3   :  { %v36_v12 = vpop.xlane.xlu0 %35 }
  0xa4   :  { %v46_v13 = vmul.f32 0.00390625, %v36_v12  ;;  %v42_v14 = vpop.xlane.xlu1 %41 }
  0xa5   :  { %v387_v15 = vmul.f32 0.00390625, %v42_v14 }
  0xa6   :  { %v50_v16 = vsub.f32 %v363_v0, %v46_v13  ;;  %v51_v17 = vsub.f32 %v365_v1, %v46_v13 }
  0xa7   :  { %v39_v18 = vpop.xlane.xlu0 %38  ;;  %v54_v19 = vsub.f32 %v367_v2, %v387_v15  ;;  %v55_v20 = vsub.f32 %v371_v4, %v387_v15 }
  0xa8   :  { %v47_v21 = vmul.f32 0.00390625, %v39_v18  ;;  %v45_v22 = vpop.xlane.xlu1 %44  ;;  %v58_v23 = vmul.f32 %v50_v16, %v50_v16  ;;  %v59_v24 = vmul.f32 %v51_v17, %v51_v17 }
  0xa9   :  { %v49_v25 = vmul.f32 0.00390625, %v45_v22  ;;  %v62_v26 = vmul.f32 %v54_v19, %v54_v19  ;;  %v63_v27 = vmul.f32 %v55_v20, %v55_v20 }
  0xaa   :  { %v66_v28 = vadd.f32 %v59_v24, %v58_v23  ;;  %v52_v29 = vsub.f32 %v373_v5, %v47_v21  ;;  %v53_v30 = vsub.f32 %v375_v6, %v47_v21 }
  0xab   :  { %v56_v31 = vsub.f32 %v379_v8, %v49_v25  ;;  %v57_v32 = vsub.f32 %v381_v9, %v49_v25  ;;  %v72_v33 = vadd.f32 %v63_v27, %v62_v26 }
  0xac   :  { %67 = vadd.xlane.f32.xlu0 %v66_v28  ;;  %v60_v34 = vmul.f32 %v52_v29, %v52_v29  ;;  %v61_v35 = vmul.f32 %v53_v30, %v53_v30 }
  0xad   :  { %v64_v36 = vmul.f32 %v56_v31, %v56_v31  ;;  %v65_v37 = vmul.f32 %v57_v32, %v57_v32 }
  0xae   :  { %v69_v38 = vadd.f32 %v61_v35, %v60_v34 }
  0xaf   :  { %v75_v39 = vadd.f32 %v65_v37, %v64_v36 }
  0xb0   :  { %73 = vadd.xlane.f32.xlu0 %v72_v33  ;;  %70 = vadd.xlane.f32.xlu1 %v69_v38 }
  0xb4   :  { %76 = vadd.xlane.f32.xlu1 %v75_v39 }
 0x139   :  { %v68_v41 = vpop.xlane.xlu0 %67 }
 0x13a   :  { %v78_v42 = vmul.f32 0.00390625, %v68_v41 }
 0x13c   :  { %v82_v43 = vadd.f32 1e-05, %v78_v42 }
 0x13d   :  { %v71_v44 = vpop.xlane.xlu1 %70  ;;  %v74_v45 = vpop.xlane.xlu0 %73 }
 0x13e   :  { %254 = vrsqrt.f32 %v82_v43  ;;  %v79_v46 = vmul.f32 0.00390625, %v71_v44  ;;  %v80_v47 = vmul.f32 0.00390625, %v74_v45 }
 0x140   :  { %v83_v48 = vadd.f32 1e-05, %v79_v46  ;;  %v84_v49 = vadd.f32 1e-05, %v80_v47 }
 0x141   :  { %v77_v50 = vpop.xlane.xlu1 %76 }
 0x142   :  { %256 = vrsqrt.f32 %v83_v48  ;;  %v81_v51 = vmul.f32 0.00390625, %v77_v50 }
 0x143   :  { %258 = vrsqrt.f32 %v84_v49 }
 0x144   :  { %v85_v52 = vadd.f32 1e-05, %v81_v51 }
 0x146   :  { %260 = vrsqrt.f32 %v85_v52 }
 0x148   :  { %v255_v54 = vpop.eup %254 }
 0x149   :  { %v94_v55 = vmul.f32 %v255_v54, %v90_v53 }
 0x14b   :  { %v98_v57 = vmul.f32 %v94_v55, %v46_v13  ;;  %v331_v13 = vmov 1  }
 0x14c   :  { %v257_v58 = vpop.eup %256 }
 0x14d   :  { %v259_v60 = vpop.eup %258  ;;  %106 = vrot.lane.b32.xlu0 %v98_v57, %s330_s28  ;;  %v95_v61 = vmul.f32 %v257_v58, %v91_v56 }
 0x14e   :  { %v96_v63 = vmul.f32 %v259_v60, %v92_v59 }
 0x14f   :  { %v99_v62 = vmul.f32 %v95_v61, %v47_v21 }
 0x150   :  { %v261_v3 = vpop.eup %260  ;;  %v100_v10 = vmul.f32 %v96_v63, %v387_v15 }
 0x151   :  { %108 = vrot.lane.b32.xlu1 %v99_v62, %s330_s28  ;;  %124 = vperm.xlu0 %250, %v94_v55   ;;  %v97_v11 = vmul.f32 %v261_v3, %v93_v7 }
 0x153   :  { %v101_v12 = vmul.f32 %v97_v11, %v49_v25 }
 0x155   :  { %110 = vrot.lane.b32.xlu1 %v100_v10, %s330_s28  ;;  %139 = vperm.xlu0 %250, %v97_v11  }
 0x159   :  { %112 = vrot.lane.b32.xlu1 %v101_v12, %s330_s28  ;;  %253 = vset.pattern.permute.xlu0 %v331_v13 }
 0x15d   :  { %129 = vperm.xlu1 %251, %v95_v61  }
 0x161   :  { %134 = vperm.xlu1 %251, %v96_v63  }
 0x165   :  { %252 = vset.pattern.permute.xlu1 %v331_v13 }
 0x1bf   :  { %v107_v14 = vpop.permute.xlu0 %106 }
 0x1c0   :  { %v118_v16 = vsub.f32 %v90_v53, %v107_v14 }
 0x1c2   :  { %152 = vperm.xlu1 %252, %v118_v16  }
 0x1c3   :  { %v109_v17 = vpop.permute.xlu1 %108 }
 0x1c4   :  { %v119_v18 = vsub.f32 %v91_v56, %v109_v17 }
 0x1c6   :  { %157 = vperm.xlu0 %253, %v119_v18  }
 0x1c7   :  { %v111_v19 = vpop.permute.xlu1 %110 }
 0x1c8   :  { %v120_v20 = vsub.f32 %v92_v59, %v111_v19 }
 0x1ca   :  { %162 = vperm.xlu1 %252, %v120_v20  }
 0x1cb   :  { %v113_v15 = vpop.permute.xlu1 %112 }
 0x1cc   :  { %v121_v21 = vsub.f32 %v93_v7, %v113_v15 }
 0x1ce   :  { %167 = vperm.xlu1 %252, %v121_v21  }
 0x1d0   :  { %v125_v23 = vpop.permute.xlu0 %124 }
 0x1d1   :  { %v142_v25 = vmul.f32 %v125_v23, %v363_v0  ;;  %v143_v26 = vmul.f32 %v125_v23, %v365_v1 }
 0x1d4   :  { %v140_v27 = vpop.permute.xlu0 %139 }
 0x1d5   :  { %v148_v45 = vmul.f32 %v140_v27, %v379_v8  ;;  %v149_v46 = vmul.f32 %v140_v27, %v381_v9 }
 0x1dc   :  { %v130_v22 = vpop.permute.xlu1 %129 }
 0x1dd   :  { %v144_v31 = vmul.f32 %v130_v22, %v373_v5  ;;  %v145_v32 = vmul.f32 %v130_v22, %v375_v6 }
 0x1e0   :  { %v135_v24 = vpop.permute.xlu1 %134 }
 0x1e1   :  { %v146_v38 = vmul.f32 %v135_v24, %v367_v2  ;;  %v147_v39 = vmul.f32 %v135_v24, %v371_v4 }
 0x241   :  { %v153_v28 = vpop.permute.xlu1 %152 }
 0x242   :  { %v170_v29 = vadd.f32 %v153_v28, %v142_v25  ;;  %v171_v30 = vadd.f32 %v153_v28, %v143_v26 }
 0x244   :  { %v178_v33 = vmul.f32 0.5, %v170_v29  ;;  %v179_v34 = vmul.f32 0.5, %v171_v30 }
 0x245   :  { %v158_v35 = vpop.permute.xlu0 %157 }
 0x246   :  { %262 = vtanh.f32 %v178_v33  ;;  %v172_v36 = vadd.f32 %v158_v35, %v144_v31  ;;  %v173_v37 = vadd.f32 %v158_v35, %v145_v32 }
 0x247   :  { %264 = vtanh.f32 %v179_v34 }
 0x248   :  { %v180_v40 = vmul.f32 0.5, %v172_v36  ;;  %v181_v41 = vmul.f32 0.5, %v173_v37 }
 0x249   :  { %v163_v42 = vpop.permute.xlu1 %162 }
 0x24a   :  { %266 = vtanh.f32 %v180_v40  ;;  %v174_v43 = vadd.f32 %v163_v42, %v146_v38  ;;  %v175_v44 = vadd.f32 %v163_v42, %v147_v39 }
 0x24b   :  { %268 = vtanh.f32 %v181_v41 }
 0x24c   :  { %v182_v47 = vmul.f32 0.5, %v174_v43  ;;  %v183_v48 = vmul.f32 0.5, %v175_v44 }
 0x24d   :  { %v168_v49 = vpop.permute.xlu1 %167 }
 0x24e   :  { %270 = vtanh.f32 %v182_v47  ;;  %v176_v50 = vadd.f32 %v168_v49, %v148_v45  ;;  %v177_v51 = vadd.f32 %v168_v49, %v149_v46 }
 0x24f   :  { %272 = vtanh.f32 %v183_v48 }
 0x250   :  { %v263_v52 = vpop.eup %262  ;;  %v184_v53 = vmul.f32 0.5, %v176_v50  ;;  %v185_v54 = vmul.f32 0.5, %v177_v51 }
 0x251   :  { %v265_v55 = vpop.eup %264  ;;  %v194_v56 = vmul.f32 0.5, %v263_v52 }
 0x252   :  { %v195_v57 = vmul.f32 0.5, %v265_v55  ;;  %274 = vtanh.f32 %v184_v53 }
 0x253   :  { %v202_v58 = vadd.f32 0.5, %v194_v56  ;;  %276 = vtanh.f32 %v185_v54 }
 0x254   :  { %v267_v59 = vpop.eup %266  ;;  %v203_v60 = vadd.f32 0.5, %v195_v57 }
 0x255   :  { %v269_v61 = vpop.eup %268  ;;  %v210_v62 = vmul.f32 %v202_v58, %v363_v0  ;;  %v196_v63 = vmul.f32 0.5, %v267_v59 }
 0x256   :  { %v211_v3 = vmul.f32 %v203_v60, %v365_v1  ;;  %v197_v7 = vmul.f32 0.5, %v269_v61 }
 0x257   :  { %218 = vst [vmem:[#allocation5] sm:$0xff] %v210_v62  ;;  %v204_v10 = vadd.f32 0.5, %v196_v63 }
 0x258   :  { %v271_v11 = vpop.eup %270  ;;  %219 = vst [vmem:[#allocation5 + $0x8] sm:$0xff] %v211_v3  ;;  %v205_v12 = vadd.f32 0.5, %v197_v7 }
 0x259   :  { %v273_v13 = vpop.eup %272  ;;  %v212_v14 = vmul.f32 %v204_v10, %v373_v5  ;;  %v198_v16 = vmul.f32 0.5, %v271_v11 }
 0x25a   :  { %v213_v17 = vmul.f32 %v205_v12, %v375_v6  ;;  %v199_v18 = vmul.f32 0.5, %v273_v13 }
 0x25b   :  { %220 = vst [vmem:[#allocation5 + $0x10] sm:$0xff] %v212_v14  ;;  %v206_v19 = vadd.f32 0.5, %v198_v16 }
 0x25c   :  { %v275_v20 = vpop.eup %274  ;;  %221 = vst [vmem:[#allocation5 + $0x18] sm:$0xff] %v213_v17  ;;  %v207_v0 = vadd.f32 0.5, %v199_v18 }
 0x25d   :  { %v277_v15 = vpop.eup %276  ;;  %v214_v1 = vmul.f32 %v206_v19, %v367_v2  ;;  %v200_v21 = vmul.f32 0.5, %v275_v20 }
 0x25e   :  { %v215_v22 = vmul.f32 %v207_v0, %v371_v4  ;;  %v201_v23 = vmul.f32 0.5, %v277_v15 }
 0x25f   :  { %222 = vst [vmem:[#allocation5 + $0x20] sm:$0xff] %v214_v1  ;;  %v208_v24 = vadd.f32 0.5, %v200_v21 }
 0x260   :  { %223 = vst [vmem:[#allocation5 + $0x28] sm:$0xff] %v215_v22  ;;  %v209_v5 = vadd.f32 0.5, %v201_v23 }
 0x261   :  { %v216_v6 = vmul.f32 %v208_v24, %v379_v8 }
 0x262   :  { %v217_v25 = vmul.f32 %v209_v5, %v381_v9 }
 0x263   :  { %224 = vst [vmem:[#allocation5 + $0x30] sm:$0xff] %v216_v6 }
 0x264   :  { %225 = vst [vmem:[#allocation5 + $0x38] sm:$0xff] %v217_v25 }
 0x265   :  { %311 = shalt.err (!%p308_p12)
}
 0x266   :  { %s312_s7 = scalar_lea.hbm %s445_s2, 1024 }
 0x267   :  { %p313_p13 = scmp.ne.s32.totalorder %s445_s2, %s312_s7  ;;  %p316_p0 = scmp.lt.u32.totalorder %s312_s7, %s445_s2 }
 0x269   :  { %p318_p1 = pnand %p316_p0, %p313_p13 }
 0x26b   :  { %321 = shalt.err (!%p318_p1)
}
 0x26c   :  { %237 = dma.vmem_to_hbm [thread:$0]  %s232_s3, 1024, %s445_s2, [#allocation4], %s327_s19, %s327_s19, %s328_s20  }
 0x26d   :  { %324 = dma.done.wait [#allocation4], 1024  }
 0x26e   :  { %325 = vsyncadd [#allocation4], 4294966272 }
 0x26f   :  { %241 = vsyncpa [#allocation3], 1 }
 0x270   :  { %242 = vsyncpa [#allocation4], 1 }

</bundles_post_ra>
